<compile_context>
chip_gen: v5e
topology: v5e:2x2
jax: 0.10.0
libtpu: 0.0.40
codegen_flags: <defaults>
</compile_context>

<pallas_src>
import functools

import jax
import jax.numpy as jnp
from jax.experimental import pallas as pl
from jax.experimental.pallas import tpu as pltpu


# ----------------------------------------------------------------------------
# Fused kernel (one row-tile per grid step):
#   h = scale * (x @ Wd) + bd ; h = leaky_relu(h) ; y = h @ Wu + bu
# ----------------------------------------------------------------------------
def _ucp_mlp_kernel(x_ref, wd_ref, bd_ref, wu_ref, bu_ref, o_ref, *,
                    scale, neg_slope):
    # First matmul: native-dtype operands on the MXU, f32 accumulation.
    h = jnp.dot(x_ref[...], wd_ref[...], preferred_element_type=jnp.float32)
    # Epilogue in f32 on the accumulator (scale folded here, not on the input).
    h = scale * h + bd_ref[...].astype(jnp.float32)
    h = jnp.where(h > 0, h, neg_slope * h)            # LeakyReLU(0.01)
    # TODO(synk): F.dropout with p=0.0 / eval mode is the identity; omitted.
    # Second matmul: cast activations to the weights' dtype (no-op for f32).
    y = jnp.dot(h.astype(wu_ref.dtype), wu_ref[...],
                preferred_element_type=jnp.float32)
    y = y + bu_ref[...].astype(jnp.float32)
    o_ref[...] = y.astype(o_ref.dtype)


def _rup(x, m):
    return (x + m - 1) // m * m


def _pad_to(x, shape):
    pads = [(0, s - d) for d, s in zip(x.shape, shape)]
    if all(p == (0, 0) for p in pads):
        return x
    return jnp.pad(x, pads)


def ucp_prompt_learner_forward(class_tokens, w_down, b_down, w_up, b_up, *,
                               scale, neg_slope=0.01, block_rows=256):
    """Forward pass of UnifiedClassSpecificPromptLearner (module='mlp').

    class_tokens: [n_cls, token_dim]
    w_down: [token_dim, hidden_dim], b_down: [1, hidden_dim]
    w_up:   [hidden_dim, clip_dim],  b_up:   [1, clip_dim]
    """
    n_cls, token_dim = class_tokens.shape
    hidden_dim = w_down.shape[1]
    clip_dim = w_up.shape[1]

    # --- layout padding: lanes to 128, rows to the sublane / row-tile multiple.
    itemsize = jnp.dtype(class_tokens.dtype).itemsize
    sub = 8 * max(1, 4 // itemsize)          # 8 for f32, 16 for bf16
    tm = _rup(min(n_cls, block_rows), sub)
    n_pad = _rup(n_cls, tm)
    d_pad = _rup(token_dim, 128)
    h_pad = _rup(hidden_dim, 128)
    c_pad = _rup(clip_dim, 128)

    x_p = _pad_to(class_tokens, (n_pad, d_pad))
    wd_p = _pad_to(w_down, (d_pad, h_pad))
    bd_p = _pad_to(b_down, (1, h_pad))
    wu_p = _pad_to(w_up, (h_pad, c_pad))
    bu_p = _pad_to(b_up, (1, c_pad))

    kernel = functools.partial(_ucp_mlp_kernel, scale=float(scale),
                               neg_slope=float(neg_slope))
    # TODO(synk): learnable scale (cfg.SCALE <= 0 -> sigmoid(param)) not handled;
    # this path implements the plain-float scale branch of the module.

    const = lambda shape: pl.BlockSpec(shape, lambda i: (0, 0))

    itemsize_out = jnp.dtype(class_tokens.dtype).itemsize
    cost = pl.CostEstimate(
        flops=2 * n_pad * d_pad * h_pad + 2 * n_pad * h_pad * c_pad,
        transcendentals=0,
        bytes_accessed=(x_p.size + wd_p.size + bd_p.size + wu_p.size
                        + bu_p.size + n_pad * c_pad) * itemsize_out,
    )

    out_p = pl.pallas_call(
        kernel,
        out_shape=jax.ShapeDtypeStruct((n_pad, c_pad), class_tokens.dtype),
        grid=(n_pad // tm,),
        in_specs=[
            pl.BlockSpec((tm, d_pad), lambda i: (i, 0)),   # class tokens (streamed)
            const((d_pad, h_pad)),                         # W_down (VMEM-resident)
            const((1, h_pad)),                             # b_down (resident)
            const((h_pad, c_pad)),                         # W_up   (resident)
            const((1, c_pad)),                             # b_up   (resident)
        ],
        out_specs=pl.BlockSpec((tm, c_pad), lambda i: (i, 0)),
        compiler_params=pltpu.CompilerParams(
            dimension_semantics=("parallel",)),
        cost_estimate=cost,
    )(x_p, wd_p, bd_p, wu_p, bu_p)

    return out_p[:n_cls, :clip_dim]


# ----------------------------------------------------------------------------
# Deterministic parameter init, mirroring Linear.reset_parameters:
#   weight [in, out] ~ U(-1/sqrt(out), 1/sqrt(out)); bias [out] same stdv.
# ----------------------------------------------------------------------------
def init_params(key, token_dim, hidden_dim, clip_dim, dtype=jnp.float32):
    k0, k1, k2, k3 = jax.random.split(key, 4)
    stdv_d = 1.0 / jnp.sqrt(jnp.float32(hidden_dim))
    stdv_u = 1.0 / jnp.sqrt(jnp.float32(clip_dim))
    w_down = jax.random.uniform(k0, (token_dim, hidden_dim), dtype,
                                minval=-stdv_d, maxval=stdv_d)
    b_down = jax.random.uniform(k1, (1, hidden_dim), dtype,
                                minval=-stdv_d, maxval=stdv_d)
    w_up = jax.random.uniform(k2, (hidden_dim, clip_dim), dtype,
                              minval=-stdv_u, maxval=stdv_u)
    b_up = jax.random.uniform(k3, (1, clip_dim), dtype,
                              minval=-stdv_u, maxval=stdv_u)
    return w_down, b_down, w_up, b_up


def _reference(class_tokens, w_down, b_down, w_up, b_up, scale, neg_slope=0.01):
    x = class_tokens * scale
    h = x @ w_down + b_down
    h = jnp.where(h > 0, h, neg_slope * h)
    return h @ w_up + b_up


if __name__ == "__main__":
    key = jax.random.PRNGKey(0)
    k_tok, k_par = jax.random.split(key)

    # Small synthetic shapes consistent with the module:
    #   n_cls classnames, token_dim word-vector dim, hidden_dim, clip_dim.
    n_cls, token_dim, hidden_dim, clip_dim = 8, 32, 32, 64
    scale = 0.5  # trainer_cfg.SCALE > 0 -> plain float multiplier

    class_tokens = jax.random.normal(k_tok, (n_cls, token_dim), jnp.float32)
    w_down, b_down, w_up, b_up = init_params(k_par, token_dim, hidden_dim,
                                             clip_dim)

    out = ucp_prompt_learner_forward(class_tokens, w_down, b_down, w_up, b_up,
                                     scale=scale)
    out = jax.block_until_ready(out)

    ref = _reference(class_tokens, w_down, b_down, w_up, b_up, scale)
    assert out.shape == (n_cls, clip_dim)
    assert jnp.allclose(out, ref, atol=1e-5, rtol=1e-5)

    print("KERNEL_OK")
</pallas_src>

<mosaic_0001>
module attributes {stable_mosaic.version = 11 : i64} {
  func.func @_ucp_mlp_kernel(%arg0: i32, %arg1: memref<8x128xf32, #tpu.memory_space<vmem>>, %arg2: memref<128x128xf32, #tpu.memory_space<vmem>>, %arg3: memref<1x128xf32, #tpu.memory_space<vmem>>, %arg4: memref<128x128xf32, #tpu.memory_space<vmem>>, %arg5: memref<1x128xf32, #tpu.memory_space<vmem>>, %arg6: memref<8x128xf32, #tpu.memory_space<vmem>>) attributes {dimension_semantics = [#tpu.dimension_semantics<parallel>], iteration_bounds = array<i64: 1>, scalar_prefetch = 0 : i64, scratch_operands = 0 : i64, tpu.core_type = #tpu.core_type<tc>, window_params = [{transform_indices = @transform_0, window_bounds = array<i64: 8, 128>}, {pipeline_mode = #tpu.pipeline_mode<synchronous>, transform_indices = @transform_1, window_bounds = array<i64: 128, 128>}, {pipeline_mode = #tpu.pipeline_mode<synchronous>, transform_indices = @transform_2, window_bounds = array<i64: 1, 128>}, {pipeline_mode = #tpu.pipeline_mode<synchronous>, transform_indices = @transform_3, window_bounds = array<i64: 128, 128>}, {pipeline_mode = #tpu.pipeline_mode<synchronous>, transform_indices = @transform_4, window_bounds = array<i64: 1, 128>}, {transform_indices = @transform_5, window_bounds = array<i64: 8, 128>}]} {
    %c0 = arith.constant 0 : index
    %c0_0 = arith.constant 0 : index
    %0 = vector.load %arg1[%c0, %c0_0] : memref<8x128xf32, #tpu.memory_space<vmem>>, vector<8x128xf32>
    %c0_1 = arith.constant 0 : index
    %c0_2 = arith.constant 0 : index
    %1 = vector.load %arg2[%c0_1, %c0_2] : memref<128x128xf32, #tpu.memory_space<vmem>>, vector<128x128xf32>
    %cst = arith.constant dense<0.000000e+00> : vector<8x128xf32>
    %2 = tpu.matmul %0, %1, %cst {dimension_numbers = #tpu.dot_dimension_numbers<[1], [0], [0], [1], [0, 0, 1, 1], [], []>} : vector<8x128xf32>, vector<128x128xf32>, vector<8x128xf32> -> vector<8x128xf32>
    %cst_3 = arith.constant 5.000000e-01 : f32
    %3 = vector.broadcast %cst_3 : f32 to vector<8x128xf32>
    %4 = arith.mulf %3, %2 : vector<8x128xf32>
    %c0_4 = arith.constant 0 : index
    %c0_5 = arith.constant 0 : index
    %5 = vector.load %arg3[%c0_4, %c0_5] : memref<1x128xf32, #tpu.memory_space<vmem>>, vector<1x128xf32>
    %6 = vector.broadcast %5 : vector<1x128xf32> to vector<8x128xf32>
    %7 = arith.addf %4, %6 : vector<8x128xf32>
    %cst_6 = arith.constant 0.000000e+00 : f32
    %8 = vector.broadcast %cst_6 : f32 to vector<8x128xf32>
    %9 = arith.cmpf ogt, %7, %8 : vector<8x128xf32>
    %cst_7 = arith.constant 0.00999999977 : f32
    %10 = vector.broadcast %cst_7 : f32 to vector<8x128xf32>
    %11 = arith.mulf %10, %7 : vector<8x128xf32>
    %12 = arith.select %9, %7, %11 : vector<8x128xi1>, vector<8x128xf32>
    %c0_8 = arith.constant 0 : index
    %c0_9 = arith.constant 0 : index
    %13 = vector.load %arg4[%c0_8, %c0_9] : memref<128x128xf32, #tpu.memory_space<vmem>>, vector<128x128xf32>
    %cst_10 = arith.constant dense<0.000000e+00> : vector<8x128xf32>
    %14 = tpu.matmul %12, %13, %cst_10 {dimension_numbers = #tpu.dot_dimension_numbers<[1], [0], [0], [1], [0, 0, 1, 1], [], []>} : vector<8x128xf32>, vector<128x128xf32>, vector<8x128xf32> -> vector<8x128xf32>
    %c0_11 = arith.constant 0 : index
    %c0_12 = arith.constant 0 : index
    %15 = vector.load %arg5[%c0_11, %c0_12] : memref<1x128xf32, #tpu.memory_space<vmem>>, vector<1x128xf32>
    %16 = vector.broadcast %15 : vector<1x128xf32> to vector<8x128xf32>
    %17 = arith.addf %14, %16 : vector<8x128xf32>
    %c0_13 = arith.constant 0 : index
    %c0_14 = arith.constant 0 : index
    %18 = vector.load %arg6[%c0_13, %c0_14] : memref<8x128xf32, #tpu.memory_space<vmem>>, vector<8x128xf32>
    tpu.vector_store %arg6[%c0_13, %c0_14], %17 {strides = array<i32>} : memref<8x128xf32, #tpu.memory_space<vmem>>, vector<8x128xf32>,
    return
  }
  func.func @transform_0(%arg0: i32) -> (i32, i32) {
    %c0_i32 = arith.constant 0 : i32
    %c0_i32_0 = arith.constant 0 : i32
    return %arg0, %c0_i32 : i32, i32
  }
  func.func @transform_1(%arg0: i32) -> (i32, i32) {
    %c0_i32 = arith.constant 0 : i32
    %c0_i32_0 = arith.constant 0 : i32
    %c0_i32_1 = arith.constant 0 : i32
    return %c0_i32, %c0_i32_0 : i32, i32
  }
  func.func @transform_2(%arg0: i32) -> (i32, i32) {
    %c0_i32 = arith.constant 0 : i32
    %c0_i32_0 = arith.constant 0 : i32
    %c0_i32_1 = arith.constant 0 : i32
    return %c0_i32, %c0_i32_0 : i32, i32
  }
  func.func @transform_3(%arg0: i32) -> (i32, i32) {
    %c0_i32 = arith.constant 0 : i32
    %c0_i32_0 = arith.constant 0 : i32
    %c0_i32_1 = arith.constant 0 : i32
    return %c0_i32, %c0_i32_0 : i32, i32
  }
  func.func @transform_4(%arg0: i32) -> (i32, i32) {
    %c0_i32 = arith.constant 0 : i32
    %c0_i32_0 = arith.constant 0 : i32
    %c0_i32_1 = arith.constant 0 : i32
    return %c0_i32, %c0_i32_0 : i32, i32
  }
  func.func @transform_5(%arg0: i32) -> (i32, i32) {
    %c0_i32 = arith.constant 0 : i32
    %c0_i32_0 = arith.constant 0 : i32
    return %arg0, %c0_i32 : i32, i32
  }
}

</mosaic_0001>

<bundles_post_ra>
// kernel: tpu_custom_call.1
= control target key start
LH: loop header
LB: loop body
LE: loop exit
PB: predicated region body
PF: predicated region fallthrough
CT: control target
= control target key end

     0   :  { %10 = vsyncpa [#allocation3], 0  ;;  %s335_s0 = inlined_call_operand.hbm [shape: f32[8,128], index: 0, kind: input, shape index: {}]   ;;  %s336_s1 = inlined_call_operand.hbm [shape: f32[128,128], index: 1, kind: input, shape index: {}]   ;;  %s337_s2 = inlined_call_operand.vmem [shape: f32[1,128], index: 2, kind: input, shape index: {}]   ;;  %s338_s3 = inlined_call_operand.hbm [shape: f32[128,128], index: 3, kind: input, shape index: {}]   ;;  %s339_s4 = inlined_call_operand.vmem [shape: f32[1,128], index: 4, kind: input, shape index: {}]   ;;  %s340_s5 = inlined_call_operand.hbm [shape: f32[8,128], index: 5, kind: output, shape index: {}]  }
   0x1   :  { %11 = vsyncpa [#allocation6], 0  ;;  %s28_s20 = sshll.u32 %s336_s1, 4  ;;  %s29_s20 = int_to_ptr.hbm [resolvable:$true] %s28_s20 }
   0x2   :  { %12 = vsyncpa [#allocation4], 0  ;;  %s281_s21 = smov [#allocation5]   ;;  %s18_s25 = sshll.u32 %s335_s0, 4  ;;  %s19_s25 = int_to_ptr.hbm [resolvable:$true] %s18_s25 }
   0x3   :  { %s30_s22 = sshll.u32 %s281_s21, 4  ;;  %s282_s26 = smov 128   ;;  %s31_s22 = int_to_ptr.vmem [resolvable:$true] %s30_s22 }
   0x4   :  { %s283_s27 = smov 8   ;;  %s284_s28 = smov [#allocation2]  }
   0x5   :  { %36 = dma.hbm_to_vmem [thread:$0]  %s29_s20, 2048, %s31_s22, [#allocation6], %s282_s26, %s282_s26, %s283_s27  }
   0x6   :  { %s20_s29 = sshll.u32 %s284_s28, 4  ;;  %s43_s7 = sshll.u32 %s338_s3, 4  ;;  %s21_s29 = int_to_ptr.vmem [resolvable:$true] %s20_s29  ;;  %s44_s7 = int_to_ptr.hbm [resolvable:$true] %s43_s7 }
   0x7   :  { %23 = dma.hbm_to_vmem [thread:$0]  %s19_s25, 128, %s21_s29, [#allocation3]  }
   0x8   :  { %s285_s1 = smov [#allocation7]  }
   0x9   :  { %s45_s8 = sshll.u32 %s285_s1, 4  ;;  %s46_s8 = int_to_ptr.vmem [resolvable:$true] %s45_s8 }
   0xa   :  { %51 = dma.hbm_to_vmem [thread:$0]  %s44_s7, 2048, %s46_s8, [#allocation6], %s282_s26, %s282_s26, %s283_s27  }
   0xb   :  { %275 = dma.done.wait [#allocation3], 128  }
   0xc   :  { %276 = vsyncadd [#allocation3], 4294967168 }
   0xd   :  { %277 = dma.done.wait [#allocation6], 4096  }
   0xe   :  { %278 = vsyncadd [#allocation6], 4294963200  ;;  %v82_v0 = vld [vmem:[#allocation5 + $0x78] sm:$0xff]  ;;  %v81_v1 = vld [vmem:[#allocation5 + $0x70] sm:$0xff]  ;;  %s286_s11 = smov [#allocation8]   ;;  %s160_s15 = sshll.u32 %s340_s5, 4  ;;  %s161_s15 = int_to_ptr.hbm [resolvable:$true] %s160_s15 }
   0xf   :  { %83 = vmatpush.msra.mxu0 %v82_v0  ;;  %v80_v2 = vld [vmem:[#allocation5 + $0x68] sm:$0xff]  ;;  %v79_v3 = vld [vmem:[#allocation5 + $0x60] sm:$0xff]  ;;  %v127_v4 = vld [vmem:[#allocation7 + $0x78] sm:$0xff]  ;;  %s158_s12 = sshll.u32 %s286_s11, 4  ;;  %s159_s12 = int_to_ptr.vmem [resolvable:$true] %s158_s12 }
  0x10   :  { %v78_v5 = vld [vmem:[#allocation5 + $0x58] sm:$0xff]  ;;  %132 = vmatpush.msra.mxu1 %v127_v4  ;;  %v126_v6 = vld [vmem:[#allocation7 + $0x70] sm:$0xff]  ;;  %v125_v7 = vld [vmem:[#allocation7 + $0x68] sm:$0xff] }
  0x11   :  { %84 = vmatpush.msra.mxu0 %v81_v1  ;;  %v77_v8 = vld [vmem:[#allocation5 + $0x50] sm:$0xff]  ;;  %v124_v9 = vld [vmem:[#allocation7 + $0x60] sm:$0xff]  ;;  %v76_v10 = vld [vmem:[#allocation5 + $0x48] sm:$0xff] }
  0x12   :  { %133 = vmatpush.msra.mxu1 %v126_v6  ;;  %v123_v11 = vld [vmem:[#allocation7 + $0x58] sm:$0xff]  ;;  %v75_v12 = vld [vmem:[#allocation5 + $0x40] sm:$0xff]  ;;  %v122_v13 = vld [vmem:[#allocation7 + $0x50] sm:$0xff] }
  0x13   :  { %85 = vmatpush.msra.mxu0 %v80_v2  ;;  %v74_v14 = vld [vmem:[#allocation5 + $0x38] sm:$0xff]  ;;  %v121_v15 = vld [vmem:[#allocation7 + $0x48] sm:$0xff]  ;;  %v73_v16 = vld [vmem:[#allocation5 + $0x30] sm:$0xff] }
  0x14   :  { %134 = vmatpush.msra.mxu1 %v125_v7  ;;  %v120_v17 = vld [vmem:[#allocation7 + $0x40] sm:$0xff]  ;;  %v72_v18 = vld [vmem:[#allocation5 + $0x28] sm:$0xff]  ;;  %v119_v19 = vld [vmem:[#allocation7 + $0x38] sm:$0xff] }
  0x15   :  { %86 = vmatpush.msra.mxu0 %v79_v3  ;;  %v71_v20 = vld [vmem:[#allocation5 + $0x20] sm:$0xff]  ;;  %v118_v21 = vld [vmem:[#allocation7 + $0x30] sm:$0xff]  ;;  %v70_v22 = vld [vmem:[#allocation5 + $0x18] sm:$0xff] }
  0x16   :  { %135 = vmatpush.msra.mxu1 %v124_v9  ;;  %v117_v23 = vld [vmem:[#allocation7 + $0x28] sm:$0xff]  ;;  %v69_v24 = vld [vmem:[#allocation5 + $0x10] sm:$0xff]  ;;  %v116_v25 = vld [vmem:[#allocation7 + $0x20] sm:$0xff] }
  0x17   :  { %87 = vmatpush.msra.mxu0 %v78_v5  ;;  %v68_v26 = vld [vmem:[#allocation5 + $0x8] sm:$0xff]  ;;  %v67_v27 = vld [vmem:[#allocation5] sm:$0xff]  ;;  %v66_v28 = vld [vmem:[#allocation2] sm:$0xff] }
  0x18   :  { %136 = vmatpush.msra.mxu1 %v123_v11  ;;  %v115_v29 = vld [vmem:[#allocation7 + $0x18] sm:$0xff]  ;;  %v114_v30 = vld [vmem:[#allocation7 + $0x10] sm:$0xff]  ;;  %v113_v31 = vld [vmem:[#allocation7 + $0x8] sm:$0xff] }
  0x19   :  { %88 = vmatpush.msra.mxu0 %v77_v8  ;;  %v112_v32 = vld [vmem:[#allocation7] sm:$0xff]  ;;  %v177_v33 = vld [vmem:[%s337_s2] ss:$0 sm:$0xff] }
  0x1a   :  { %137 = vmatpush.msra.mxu1 %v122_v13  ;;  %v178_v39 = vld [vmem:[%s339_s4] ss:$0 sm:$0xff] }
  0x1b   :  { %89 = vmatpush.msra.mxu0 %v76_v10 }
  0x1c   :  { %138 = vmatpush.msra.mxu1 %v121_v15 }
  0x1d   :  { %90 = vmatpush.msra.mxu0 %v75_v12 }
  0x1e   :  { %139 = vmatpush.msra.mxu1 %v120_v17 }
  0x1f   :  { %91 = vmatpush.msra.mxu0 %v74_v14 }
  0x20   :  { %140 = vmatpush.msra.mxu1 %v119_v19 }
  0x21   :  { %92 = vmatpush.msra.mxu0 %v73_v16 }
  0x22   :  { %141 = vmatpush.msra.mxu1 %v118_v21 }
  0x23   :  { %93 = vmatpush.msra.mxu0 %v72_v18 }
  0x24   :  { %142 = vmatpush.msra.mxu1 %v117_v23 }
  0x25   :  { %94 = vmatpush.msra.mxu0 %v71_v20 }
  0x26   :  { %143 = vmatpush.msra.mxu1 %v116_v25 }
  0x27   :  { %95 = vmatpush.msra.mxu0 %v70_v22 }
  0x28   :  { %144 = vmatpush.msra.mxu1 %v115_v29 }
  0x29   :  { %96 = vmatpush.msra.mxu0 %v69_v24 }
  0x2a   :  { %145 = vmatpush.msra.mxu1 %v114_v30 }
  0x2b   :  { %97 = vmatpush.msra.mxu0 %v68_v26 }
  0x2c   :  { %146 = vmatpush.msra.mxu1 %v113_v31 }
  0x2d   :  { %98 = vmatpush.msra.mxu0 %v67_v27 }
  0x2e   :  { %99 = vmatmul.f32.vlgmr.msra.gmra.mxu0 %v66_v28  ;;  %147 = vmatpush.msra.mxu1 %v112_v32 }
  0xab   :  { %v100_v34 = vpop.f32.mrf.mxu0 }
  0xac   :  { %v103_v35 = vmul.f32 0.5, %v100_v34 }
  0xae   :  { %v108_v36 = vadd.f32 %v177_v33, %v103_v35 }
  0xb0   :  { %vm109_vm0 = vcmp.gt.f32.partialorder %v108_v36, 0.0  ;;  %v110_v37 = vmul.f32 0.01, %v108_v36 }
  0xb2   :  { %v111_v38 = vsel %vm109_vm0, %v108_v36, %v110_v37 }
  0xb3   :  { %148 = vmatmul.f32.vlgmr.msra.gmra.mxu1 %v111_v38 }
 0x130   :  { %v149_v40 = vpop.f32.mrf.mxu1 }
 0x131   :  { %v150_v41 = vadd.f32 %v178_v39, %v149_v40 }
 0x133   :  { %152 = vst [vmem:[#allocation8] sm:$0xff] %v150_v41 }
 0x134   :  { %163 = dma.vmem_to_hbm [thread:$0]  %s159_s12, 128, %s161_s15, [#allocation4]  }
 0x135   :  { %279 = dma.done.wait [#allocation4], 128  }
 0x136   :  { %280 = vsyncadd [#allocation4], 4294967168 }
 0x137   :  { %168 = vsyncpa [#allocation3], 1 }
 0x138   :  { %169 = vsyncpa [#allocation6], 1 }
 0x139   :  { %170 = vsyncpa [#allocation4], 1 }

</bundles_post_ra>
